<compile_context>
chip_gen: v7x
topology: tpu7x:2x2x1
jax: 0.10.0
libtpu: 0.0.40
codegen_flags: <defaults>
</compile_context>

<pallas_src>
import jax
import jax.numpy as jnp
from jax.experimental import pallas as pl
from jax.experimental.pallas import tpu as pltpu

_LANE = 128
_SUBLANE = 8


def _round_up(n, m):
    return ((n + m - 1) // m) * m


def _choose_tb(B, block_b, *, min_steps=2):
    """Batch tile: multiple of 8 (128 when large), >= min_steps grid steps."""
    block_b = max(_SUBLANE, (int(block_b) // _SUBLANE) * _SUBLANE)
    target = _round_up(pl.cdiv(B, min_steps), _SUBLANE)
    tb = min(block_b, target)
    if tb >= _LANE:                      # keep the MXU M dimension full
        tb = (tb // _LANE) * _LANE
    return max(tb, _SUBLANE)


def _choose_th(H, block_h):
    """Hidden-chunk size TH (multiple of 128 unless == H) and padded H."""
    if H <= block_h:
        return H, H
    th = max(_LANE, (int(block_h) // _LANE) * _LANE)
    return th, _round_up(H, th)


def _spec(shape, index_map, mode=None):
    if mode is None:
        return pl.BlockSpec(shape, index_map)
    return pl.BlockSpec(shape, index_map, pipeline_mode=mode)


def mlp_kernel(x_ref, w1_ref, b1_ref, w2_ref, b2_ref, o_ref, acc_ref):
    h_idx = pl.program_id(1)

    @pl.when(h_idx == 0)
    def _init():
        acc_ref[...] = jnp.zeros_like(acc_ref)

    # Hidden-layer chunk: stream x in its source dtype, cast to bf16 for the
    # MXU (hidden under the matmul), accumulate in f32.
    xb = x_ref[...].astype(jnp.bfloat16)
    h = jnp.dot(xb, w1_ref[...], preferred_element_type=jnp.float32)
    h = h + b1_ref[...]                              # (TB, TH) + (1, TH), f32
    # sigmoid(h) = 0.5 * tanh(0.5 * h) + 0.5 : a single EUP transcendental;
    # the muls/adds ride the VALU which has slack.
    h = 0.5 * jnp.tanh(0.5 * h) + 0.5
    # This hidden chunk's contribution to the output matmul (f32 accumulate).
    acc_ref[...] += jnp.dot(h.astype(w2_ref.dtype), w2_ref[...],
                            preferred_element_type=jnp.float32)

    @pl.when(h_idx == pl.num_programs(1) - 1)
    def _store():
        o_ref[...] = (acc_ref[...] + b2_ref[...]).astype(o_ref.dtype)


def prepare_params(w1, b1, w2, b2, *, block_h=2048):
    """One-time parameter conversion (hoisted out of the forward pass).

    Casts weights to bf16 and, if the hidden dim is tiled, zero-pads H so it is
    a multiple of the chunk size TH (padded hidden units contribute 0 because
    the corresponding w2 rows are zero). Returns ((w1,b1,w2,b2), TH).
    """
    F, H = w1.shape
    O = w2.shape[1]
    th, H_pad = _choose_th(H, block_h)
    w1b = w1.astype(jnp.bfloat16)
    w2b = w2.astype(jnp.bfloat16)
    b1f = jnp.reshape(b1, (1, H)).astype(jnp.float32)
    b2f = jnp.reshape(b2, (1, O)).astype(jnp.float32)
    if H_pad != H:
        w1b = jnp.zeros((F, H_pad), jnp.bfloat16).at[:, :H].set(w1b)
        b1f = jnp.zeros((1, H_pad), jnp.float32).at[:, :H].set(b1f)
        w2b = jnp.zeros((H_pad, O), jnp.bfloat16).at[:H, :].set(w2b)
    return (w1b, b1f, w2b, b2f), th


def mlp_forward_prepared(x, prepared, th, *, block_b=512):
    """Fused MLP forward with pre-converted params. x: (B, F) float."""
    w1b, b1f, w2b, b2f = prepared
    B, F = x.shape
    H_pad = w1b.shape[1]
    O = w2b.shape[1]
    n_h = H_pad // th

    TB = _choose_tb(B, block_b)
    B_pad = _round_up(B, TB)
    if B_pad != B:
        x = jnp.pad(x, ((0, B_pad - B), (0, 0)))
    n_b = B_pad // TB

    # Single-buffer constant-index operands; stream (double-buffer) the
    # weight chunks only when H is actually tiled.
    resident = pl.Buffered(1)
    w_mode = resident if n_h == 1 else None

    # VMEM footprint (per-step working set) -> raise the scoped limit with
    # headroom; clamp to v7x's 64 MiB physical.
    nbuf_w = 1 if n_h == 1 else 2
    itemsize_x = jnp.dtype(x.dtype).itemsize
    vmem_bytes = (
        2 * TB * F * itemsize_x                       # streamed x tile (2 bufs)
        + nbuf_w * (F * th * 2 + th * 4 + th * O * 2)  # w1, b1, w2 chunks
        + O * 4                                        # b2 (single buffer)
        + 2 * TB * O * 4                               # output tile (2 bufs)
        + TB * O * 4                                   # acc scratch
        + TB * th * (4 + 2))                           # h (f32) + bf16 copy
    vmem_limit = int(min(64 * 1024 * 1024,
                         max(16 * 1024 * 1024, 2 * vmem_bytes)))

    flops = 2 * B_pad * F * H_pad + 2 * B_pad * H_pad * O
    bytes_accessed = (B_pad * F * itemsize_x
                      + F * H_pad * 2 + H_pad * 4 + H_pad * O * 2 + O * 4
                      + B_pad * O * 4)

    out = pl.pallas_call(
        mlp_kernel,
        out_shape=jax.ShapeDtypeStruct((B_pad, O), jnp.float32),
        grid_spec=pltpu.PrefetchScalarGridSpec(
            num_scalar_prefetch=0,
            grid=(n_b, n_h),
            in_specs=[
                _spec((TB, F), lambda i, h: (i, 0)),              # streamed x
                _spec((F, th), lambda i, h: (0, h), w_mode),      # W1 chunk
                _spec((1, th), lambda i, h: (0, h), w_mode),      # b1 chunk
                _spec((th, O), lambda i, h: (h, 0), w_mode),      # W2 chunk
                _spec((1, O), lambda i, h: (0, 0), resident),     # b2 (const)
            ],
            out_specs=pl.BlockSpec((TB, O), lambda i, h: (i, 0)),
            scratch_shapes=[pltpu.VMEM((TB, O), jnp.float32)],
        ),
        compiler_params=pltpu.CompilerParams(
            dimension_semantics=("parallel", "arbitrary"),
            vmem_limit_bytes=vmem_limit),
        cost_estimate=pl.CostEstimate(
            flops=flops,
            transcendentals=B_pad * H_pad,
            bytes_accessed=bytes_accessed),
    )(x, w1b, b1f, w2b, b2f)

    return out[:B] if B_pad != B else out


def mlp_forward(x, w1, b1, w2, b2, *, block_b=512, block_h=2048):
    """Convenience wrapper (converts params every call; prefer prepare_params)."""
    prepared, th = prepare_params(w1, b1, w2, b2, block_h=block_h)
    return mlp_forward_prepared(x, prepared, th, block_b=block_b)


def init_params(key, n_feature, n_hidden, n_output):
    # Deterministic init mimicking torch.nn.Linear default:
    # U(-1/sqrt(fan_in), 1/sqrt(fan_in)) for both weight and bias.
    k1, k2, k3, k4 = jax.random.split(key, 4)
    bound1 = 1.0 / jnp.sqrt(n_feature)
    bound2 = 1.0 / jnp.sqrt(n_hidden)
    # Stored as (in, out) -- transpose of PyTorch's (out, in) layout.
    w1 = jax.random.uniform(k1, (n_feature, n_hidden), jnp.float32, -bound1, bound1)
    b1 = jax.random.uniform(k2, (1, n_hidden), jnp.float32, -bound1, bound1)
    w2 = jax.random.uniform(k3, (n_hidden, n_output), jnp.float32, -bound2, bound2)
    b2 = jax.random.uniform(k4, (1, n_output), jnp.float32, -bound2, bound2)
    return w1, b1, w2, b2


if __name__ == "__main__":
    key = jax.random.PRNGKey(0)
    kx, kp = jax.random.split(key)

    # Small demo shapes. B is deliberately not a multiple of the batch tile
    # (exercises padding + a multi-step pipelined batch axis) and block_h is
    # set below n_hidden to exercise the H-reduction axis + accumulator path.
    B, n_feature, n_hidden, n_output = 200, 32, 256, 16
    x = jax.random.normal(kx, (B, n_feature), jnp.float32)
    w1, b1, w2, b2 = init_params(kp, n_feature, n_hidden, n_output)

    prepared, th = prepare_params(w1, b1, w2, b2, block_h=128)   # 2 H-chunks
    out = mlp_forward_prepared(x, prepared, th, block_b=64)      # 4 batch tiles
    out = jax.block_until_ready(out)

    # Reference in plain JAX with the same bf16 rounding the kernel uses
    # (bf16 x / W1 / W2 and bf16 activations into the second matmul).
    xb = x.astype(jnp.bfloat16).astype(jnp.float32)
    w1b = w1.astype(jnp.bfloat16).astype(jnp.float32)
    w2b = w2.astype(jnp.bfloat16).astype(jnp.float32)
    hid = jax.nn.sigmoid(xb @ w1b + b1)
    ref = hid.astype(jnp.bfloat16).astype(jnp.float32) @ w2b + b2

    assert out.shape == (B, n_output)
    assert jnp.allclose(out, ref, atol=2e-2, rtol=2e-2), \
        float(jnp.max(jnp.abs(out - ref)))

    print("KERNEL_OK")
</pallas_src>

<mosaic_0001>
module attributes {stable_mosaic.version = 11 : i64} {
  func.func @mlp_kernel(%arg0: i32, %arg1: i32, %arg2: memref<64x32xf32, #tpu.memory_space<vmem>>, %arg3: memref<32x128xbf16, #tpu.memory_space<vmem>>, %arg4: memref<1x128xf32, #tpu.memory_space<vmem>>, %arg5: memref<128x16xbf16, #tpu.memory_space<vmem>>, %arg6: memref<1x16xf32, #tpu.memory_space<vmem>>, %arg7: memref<64x16xf32, #tpu.memory_space<vmem>>, %arg8: memref<64x16xf32, #tpu.memory_space<vmem>>) attributes {dimension_semantics = [#tpu.dimension_semantics<parallel>, #tpu.dimension_semantics<arbitrary>], iteration_bounds = array<i64: 4, 2>, scalar_prefetch = 0 : i64, scratch_operands = 1 : i64, tpu.core_type = #tpu.core_type<tc>, window_params = [{transform_indices = @transform_0, window_bounds = array<i64: 64, 32>}, {transform_indices = @transform_1, window_bounds = array<i64: 32, 128>}, {transform_indices = @transform_2, window_bounds = array<i64: 1, 128>}, {transform_indices = @transform_3, window_bounds = array<i64: 128, 16>}, {pipeline_mode = #tpu.pipeline_mode<synchronous>, transform_indices = @transform_4, window_bounds = array<i64: 1, 16>}, {transform_indices = @transform_5, window_bounds = array<i64: 64, 16>}]} {
    %c0_i32 = arith.constant 0 : i32
    %0 = arith.cmpi eq, %arg1, %c0_i32 : i32
    %1 = arith.extui %0 : i1 to i32
    %c0_i32_0 = arith.constant 0 : i32
    %2 = arith.cmpi ne, %1, %c0_i32_0 : i32
    scf.if %2 {
      %cst_17 = arith.constant 0.000000e+00 : f32
      %26 = vector.broadcast %cst_17 : f32 to vector<64x16xf32>
      %c0_18 = arith.constant 0 : index
      %c0_19 = arith.constant 0 : index
      %27 = vector.load %arg8[%c0_18, %c0_19] : memref<64x16xf32, #tpu.memory_space<vmem>>, vector<64x16xf32>
      tpu.vector_store %arg8[%c0_18, %c0_19], %26 {strides = array<i32>} : memref<64x16xf32, #tpu.memory_space<vmem>>, vector<64x16xf32>,
    } else {
    }
    %c0 = arith.constant 0 : index
    %c0_1 = arith.constant 0 : index
    %3 = vector.load %arg2[%c0, %c0_1] : memref<64x32xf32, #tpu.memory_space<vmem>>, vector<64x32xf32>
    %4 = arith.truncf %3 : vector<64x32xf32> to vector<64x32xbf16>
    %c0_2 = arith.constant 0 : index
    %c0_3 = arith.constant 0 : index
    %5 = vector.load %arg3[%c0_2, %c0_3] : memref<32x128xbf16, #tpu.memory_space<vmem>>, vector<32x128xbf16>
    %cst = arith.constant dense<0.000000e+00> : vector<64x128xf32>
    %6 = tpu.matmul %4, %5, %cst {dimension_numbers = #tpu.dot_dimension_numbers<[1], [0], [0], [1], [0, 0, 1, 1], [], []>} : vector<64x32xbf16>, vector<32x128xbf16>, vector<64x128xf32> -> vector<64x128xf32>
    %c0_4 = arith.constant 0 : index
    %c0_5 = arith.constant 0 : index
    %7 = vector.load %arg4[%c0_4, %c0_5] : memref<1x128xf32, #tpu.memory_space<vmem>>, vector<1x128xf32>
    %8 = vector.broadcast %7 : vector<1x128xf32> to vector<64x128xf32>
    %9 = arith.addf %6, %8 : vector<64x128xf32>
    %cst_6 = arith.constant 5.000000e-01 : f32
    %10 = vector.broadcast %cst_6 : f32 to vector<64x128xf32>
    %11 = arith.mulf %10, %9 : vector<64x128xf32>
    %12 = math.tanh %11 : vector<64x128xf32>
    %cst_7 = arith.constant 5.000000e-01 : f32
    %13 = vector.broadcast %cst_7 : f32 to vector<64x128xf32>
    %14 = arith.mulf %13, %12 : vector<64x128xf32>
    %cst_8 = arith.constant 5.000000e-01 : f32
    %15 = vector.broadcast %cst_8 : f32 to vector<64x128xf32>
    %16 = arith.addf %14, %15 : vector<64x128xf32>
    %c0_9 = arith.constant 0 : index
    %c0_10 = arith.constant 0 : index
    %17 = vector.load %arg8[%c0_9, %c0_10] : memref<64x16xf32, #tpu.memory_space<vmem>>, vector<64x16xf32>
    %18 = arith.truncf %16 : vector<64x128xf32> to vector<64x128xbf16>
    %c0_11 = arith.constant 0 : index
    %c0_12 = arith.constant 0 : index
    %19 = vector.load %arg5[%c0_11, %c0_12] : memref<128x16xbf16, #tpu.memory_space<vmem>>, vector<128x16xbf16>
    %cst_13 = arith.constant dense<0.000000e+00> : vector<64x16xf32>
    %20 = tpu.matmul %18, %19, %cst_13 {dimension_numbers = #tpu.dot_dimension_numbers<[1], [0], [0], [1], [0, 0, 1, 1], [], []>} : vector<64x128xbf16>, vector<128x16xbf16>, vector<64x16xf32> -> vector<64x16xf32>
    %21 = arith.addf %17, %20 : vector<64x16xf32>
    %c0_14 = arith.constant 0 : index
    %c0_15 = arith.constant 0 : index
    %22 = vector.load %arg8[%c0_14, %c0_15] : memref<64x16xf32, #tpu.memory_space<vmem>>, vector<64x16xf32>
    tpu.vector_store %arg8[%c0_14, %c0_15], %21 {strides = array<i32>} : memref<64x16xf32, #tpu.memory_space<vmem>>, vector<64x16xf32>,
    %c1_i32 = arith.constant 1 : i32
    %23 = arith.cmpi eq, %arg1, %c1_i32 : i32
    %24 = arith.extui %23 : i1 to i32
    %c0_i32_16 = arith.constant 0 : i32
    %25 = arith.cmpi ne, %24, %c0_i32_16 : i32
    scf.if %25 {
      %c0_17 = arith.constant 0 : index
      %c0_18 = arith.constant 0 : index
      %26 = vector.load %arg8[%c0_17, %c0_18] : memref<64x16xf32, #tpu.memory_space<vmem>>, vector<64x16xf32>
      %c0_19 = arith.constant 0 : index
      %c0_20 = arith.constant 0 : index
      %27 = vector.load %arg6[%c0_19, %c0_20] : memref<1x16xf32, #tpu.memory_space<vmem>>, vector<1x16xf32>
      %28 = vector.broadcast %27 : vector<1x16xf32> to vector<64x16xf32>
      %29 = arith.addf %26, %28 : vector<64x16xf32>
      %c0_21 = arith.constant 0 : index
      %c0_22 = arith.constant 0 : index
      %30 = vector.load %arg7[%c0_21, %c0_22] : memref<64x16xf32, #tpu.memory_space<vmem>>, vector<64x16xf32>
      tpu.vector_store %arg7[%c0_21, %c0_22], %29 {strides = array<i32>} : memref<64x16xf32, #tpu.memory_space<vmem>>, vector<64x16xf32>,
    } else {
    }
    return
  }
  func.func @transform_0(%arg0: i32, %arg1: i32) -> (i32, i32) {
    %c0_i32 = arith.constant 0 : i32
    %c0_i32_0 = arith.constant 0 : i32
    return %arg0, %c0_i32 : i32, i32
  }
  func.func @transform_1(%arg0: i32, %arg1: i32) -> (i32, i32) {
    %c0_i32 = arith.constant 0 : i32
    %c0_i32_0 = arith.constant 0 : i32
    return %c0_i32, %arg1 : i32, i32
  }
  func.func @transform_2(%arg0: i32, %arg1: i32) -> (i32, i32) {
    %c0_i32 = arith.constant 0 : i32
    %c0_i32_0 = arith.constant 0 : i32
    return %c0_i32, %arg1 : i32, i32
  }
  func.func @transform_3(%arg0: i32, %arg1: i32) -> (i32, i32) {
    %c0_i32 = arith.constant 0 : i32
    %c0_i32_0 = arith.constant 0 : i32
    return %arg1, %c0_i32 : i32, i32
  }
  func.func @transform_4(%arg0: i32, %arg1: i32) -> (i32, i32) {
    %c0_i32 = arith.constant 0 : i32
    %c0_i32_0 = arith.constant 0 : i32
    %c0_i32_1 = arith.constant 0 : i32
    return %c0_i32, %c0_i32_0 : i32, i32
  }
  func.func @transform_5(%arg0: i32, %arg1: i32) -> (i32, i32) {
    %c0_i32 = arith.constant 0 : i32
    %c0_i32_0 = arith.constant 0 : i32
    return %arg0, %c0_i32 : i32, i32
  }
}

</mosaic_0001>

<bundles_post_ra>
// kernel: tpu_custom_call.1
= control target key start
LH: loop header
LB: loop body
LE: loop exit
PB: predicated region body
PF: predicated region fallthrough
CT: control target
= control target key end

     0   :  { %s1066_s18 = smov 0   ;;  %s1068_s19 = smov 0   ;;  %s1229_s0 = inlined_call_operand.vmem [shape: f32[256,32], index: 0, kind: input, shape index: {}]   ;;  %s1230_s1 = inlined_call_operand.vmem [shape: bf16[32,256], index: 1, kind: input, shape index: {}]   ;;  %s1231_s2 = inlined_call_operand.vmem [shape: f32[1,256], index: 2, kind: input, shape index: {}]   ;;  %s1232_s3 = inlined_call_operand.vmem [shape: bf16[256,16], index: 3, kind: input, shape index: {}]   ;;  %s1233_s4 = inlined_call_operand.vmem [shape: f32[1,16], index: 4, kind: input, shape index: {}]   ;;  %s1234_s5 = inlined_call_operand.vmem [shape: f32[256,16], index: 5, kind: output, shape index: {}]  }
   0x1   :  { %s1070_s20 = smov 0   ;;  %s1072_s21 = smov 0  }
   0x2   :  { %s1074_s22 = smov 0   ;;  %s1076_s23 = smov 0  }
   0x3   :  { %s1078_s24 = smov 0  }
   0x4 LB: > { %s24_s25 = sadd.s32 1, %s1025_s22  ;;  %s27_s26 = sadd.s32 1, %s1029_s23  ;;  %s1033_s24 = sphi %s1078_s24, %s15_s24   ;;  %s1029_s23 = sphi %s1076_s23, %s1240_s23   ;;  %s1025_s22 = sphi %s1074_s22, %s1239_s22   ;;  %s1021_s21 = sphi %s1072_s21, %s1238_s21   ;;  %s1017_s20 = sphi %s1070_s20, %s1237_s20   ;;  %s1013_s19 = sphi %s1068_s19, %s1236_s19   ;;  %s1009_s18 = sphi %s1066_s18, %s1235_s18  }
   0x5   : > { %p25_p0 = scmp.ge.s32.totalorder %s24_s25, 2  ;;  %s60_s27 = sadd.s32 1, %s1013_s19 }
   0x6   : > { %p67_p1 = scmp.ne.s32.totalorder %s1013_s19, %s1009_s18  ;;  %p68_p2 = scmp.eq.s32.totalorder %s1033_s24, 0 }
   0x7   : > { %s1242_s25 = smov (%p25_p0, %s24_s25), 0  ;;  %s1244_s26 = smov (!%p25_p0, %s27_s26), %s1029_s23 }
   0x8   : > { %s57_s28 = ssub.s32 %s1025_s22, %s1242_s25  ;;  %p69_p3 = por %p68_p2, %p67_p1 }
   0x9   : > { %p29_p4 = scmp.ge.s32.totalorder %s1244_s26, 4  ;;  %p58_p5 = scmp.eq.s32.totalorder %s57_s28, 0 }
   0xa   : > { %p811_p6 = scmp.ge.s32.totalorder %s1033_s24, 8 }
   0xb   : > { %s1246_s26 = smov (%p29_p4, %s1244_s26), 0 }
   0xc   : > { %s1115_s29 = scalar_select %p58_p5, %s1013_s19, %s60_s27  }
   0xd   : > { %195 = sbr.rel (%p811_p6) target bundleno = 27 (0x1b), region = 20 }
  0x14   : > { %207 = sbr.rel (!%p69_p3) target bundleno = 27 (0x1b), region = 28  ;;  %s209_s30 = sand.u32 (%p69_p3), 1, %s1013_s19  }
  0x15   : > { %s813_s6 = sshll.u32 (%p69_p3), %s1025_s22, 2  ;;  %s812_s7 = sshll.u32 (%p69_p3), %s209_s30, 4 }
  0x16   : > { %s213_s10 = scalar_lea.vmem (%p69_p3), %s1230_s1, %s813_s6  ;;  %s211_s11 = scalar_lea.vmem (%p69_p3), [#allocation3], %s812_s7 }
  0x17   : > { %v229_v0 = vld [vmem:[%s213_s10] sm:$0xf] (%p69_p3)  ;;  %v231_v1 = vld [vmem:[%s213_s10 + $0x8] sm:$0xf] (%p69_p3)  ;;  %v233_v2 = vld [vmem:[%s213_s10 + $0x10] sm:$0xf] (%p69_p3) }
  0x18   : > { %230 = vst [vmem:[%s211_s11] sm:$0xf] (%p69_p3), %v229_v0  ;;  %232 = vst [vmem:[%s211_s11 + $0x4] sm:$0xf] (%p69_p3), %v231_v1  ;;  %v235_v3 = vld [vmem:[%s213_s10 + $0x18] sm:$0xf] (%p69_p3) }
  0x19   : > { %234 = vst [vmem:[%s211_s11 + $0x8] sm:$0xf] (%p69_p3), %v233_v2  ;;  %236 = vst [vmem:[%s211_s11 + $0xc] sm:$0xf] (%p69_p3), %v235_v3 }
  0x1b PF: > { %p814_p7 = scmp.ge.s32.totalorder %s1033_s24, 1  ;;  %p281_p8 = scmp.lt.s32.totalorder %s1033_s24, 9 }
  0x1d   : > { %p282_p9 = pnand %p814_p7, %p281_p8 }
  0x1e   : > { %s288_s12 = sand.u32 (!%p282_p9), 1, %s1009_s18   ;;  %s816_s13 = sshll.u32 (!%p282_p9), %s1021_s21, 3 }
  0x1f   : > { %285 = sbr.rel (%p282_p9) target bundleno = 532 (0x214), region = 77  ;;  %s1127_s14 = sshll.u32 (!%p282_p9), %s288_s12, 4 }
  0x20   : > { %p329_p10 = scmp.lt.s32.totalorder (!%p282_p9), %s816_s13, 31  ;;  %p334_p11 = scmp.lt.s32.totalorder (!%p282_p9), %s1017_s20, 1 }
  0x21   : > { %s818_s17 = sshll.u32 (!%p282_p9), %s1017_s20, 4  ;;  %s290_s27 = scalar_lea.vmem (!%p282_p9), [#allocation3], %s1127_s14 }
  0x22   : > { %p338_p12 = scmp.lt.s32.totalorder (!%p282_p9), %s818_s17, 31  ;;  %p822_p13 = scmp.ne.s32.totalorder (!%p282_p9), %s1017_s20, 0 }
  0x26   : > { %s1248_s13 = smov (!%p329_p10, %s816_s13), 31  ;;  %s1250_s17 = smov (!%p338_p12, %s818_s17), 31 }
  0x27   : > { %s1131_s15 = scalar_select %p334_p11, %s1017_s20, 1 }
  0x28   : > { %s817_s16 = sshll.u32 %s1248_s13, 3  ;;  %s819_s10 = sshll.u32 %s1250_s17, 2  ;;  %vm354_vm0 = vcmask (!%p822_p13), 130048   ;;  %v1035_v4 = vmov (!%p822_p13), 0.0  }
  0x29   : > { %s1137_s30 = scalar_lea.vmem %s1229_s0, %s817_s16  ;;  %s336_s18 = scalar_lea.vmem %s1231_s2, %s1131_s15  ;;  %355 = vst.msk [vmem:[#allocation2] sm:$0xff] (!%p822_p13), %vm354_vm0, %v1035_v4  ;;  %356 = vst.msk [vmem:[#allocation2 + $0x8] sm:$0xff] (!%p822_p13), %vm354_vm0, %v1035_v4 }
  0x2a   : > { %s1146_s9 = scalar_lea.vmem %s1234_s5, %s817_s16  ;;  %s1151_s13 = scalar_lea.vmem %s1232_s3, %s819_s10  ;;  %357 = vst.msk [vmem:[#allocation2 + $0x10] sm:$0xff] (!%p822_p13), %vm354_vm0, %v1035_v4  ;;  %358 = vst.msk [vmem:[#allocation2 + $0x18] sm:$0xff] (!%p822_p13), %vm354_vm0, %v1035_v4 }
  0x2b   : > { %353 = sbr.rel (%p822_p13) target bundleno = 50 (0x32), region = 85  ;;  %359 = vst.msk [vmem:[#allocation2 + $0x20] sm:$0xff] (!%p822_p13), %vm354_vm0, %v1035_v4  ;;  %360 = vst.msk [vmem:[#allocation2 + $0x28] sm:$0xff] (!%p822_p13), %vm354_vm0, %v1035_v4 }
  0x2c   : > { %361 = vst.msk [vmem:[#allocation2 + $0x30] sm:$0xff] (!%p822_p13), %vm354_vm0, %v1035_v4  ;;  %362 = vst.msk [vmem:[#allocation2 + $0x38] sm:$0xff] (!%p822_p13), %vm354_vm0, %v1035_v4 }
  0x32 PF: > { %v953_v5 = vld [vmem:[%s290_s27] sm:$0xff]   ;;  %v954_v6 = vld [vmem:[%s290_s27 + $0x8] sm:$0xff]   ;;  %vm398_vm1 = vcmask 261120   ;;  %vm657_vm2 = vcmask 130048   ;;  %p838_p0 = scmp.ne.s32.totalorder %s1017_s20, 1 }
  0x33   : > { %860 = vmatprep.subr.bf16.mxu0 %v953_v5  ;;  %v363_v7 = vld [vmem:[%s1137_s30] sm:$0xff]  ;;  %v364_v8 = vld [vmem:[%s1137_s30 + $0x8] sm:$0xff]  ;;  %v365_v10 = vld [vmem:[%s1137_s30 + $0x10] sm:$0xff] }
  0x34   : > { %861 = vmatpush3.bf16.msra.mxu0 %v953_v5  ;;  %v371_v9 = vpack.c.bf16 %v364_v8, %v363_v7  ;;  %v366_v11 = vld [vmem:[%s1137_s30 + $0x18] sm:$0xff]  ;;  %v367_v12 = vld [vmem:[%s1137_s30 + $0x20] sm:$0xff]  ;;  %v368_v13 = vld [vmem:[%s1137_s30 + $0x28] sm:$0xff] }
  0x35   : > { %862 = vmatprep.subr.bf16.mxu0 %v954_v6  ;;  %v955_v14 = vld [vmem:[%s1151_s13] sm:$0xff]   ;;  %v372_v15 = vpack.c.bf16 %v366_v11, %v365_v10  ;;  %v956_v16 = vld [vmem:[%s1151_s13 + $0x8] sm:$0xff]   ;;  %v373_v17 = vpack.c.bf16 %v368_v13, %v367_v12  ;;  %v369_v18 = vld [vmem:[%s1137_s30 + $0x30] sm:$0xff] }
  0x36   : > { %864 = vmatprep.mubr.msk.bf16.mxu0 %vm398_vm1, %v371_v9  ;;  %872 = vmatprep.subr.bf16.mxu1 %v955_v14  ;;  %v370_v19 = vld [vmem:[%s1137_s30 + $0x38] sm:$0xff]  ;;  %v957_v21 = vld [vmem:[%s1151_s13 + $0x10] sm:$0xff]   ;;  %v959_v23 = vld [vmem:[%s1151_s13 + $0x20] sm:$0xff]  }
  0x37   : > { %873 = vmatpush3.bf16.msra.mxu1 %v955_v14  ;;  %v374_v20 = vpack.c.bf16 %v370_v19, %v369_v18  ;;  %v958_v22 = vld [vmem:[%s1151_s13 + $0x18] sm:$0xff]   ;;  %v960_v24 = vld [vmem:[%s1151_s13 + $0x28] sm:$0xff]   ;;  %v961_v25 = vld [vmem:[%s1151_s13 + $0x30] sm:$0xff]  }
  0x38   : > { %863 = vmatpush3.bf16.msra.mxu0 %v954_v6  ;;  %874 = vmatprep.subr.bf16.mxu1 %v956_v16  ;;  %v962_v26 = vld [vmem:[%s1151_s13 + $0x38] sm:$0xff]   ;;  %v823_v27 = vld [vmem:[%s336_s18] ss:$0 sm:$0xff] }
  0x39   : > { %v511_v19 = vld [vmem:[#allocation2 + $0x18] sm:$0xff] }
  0x3b   : > { %865 = vmatmul.mubr.msk.bf16.vlgmr.msra.gmra.mrb[0].mxu0 %vm398_vm1, %v372_v15  ;;  %875 = vmatpush3.bf16.msra.mxu1 %v956_v16  ;;  %v510_v16 = vld [vmem:[#allocation2 + $0x10] sm:$0xff] }
  0x3c   : > { %868 = vmatprep.mubr.msk.bf16.mxu0 %vm398_vm1, %v373_v17  ;;  %876 = vmatprep.subr.bf16.mxu1 %v957_v21  ;;  %v508_v17 = vld [vmem:[#allocation2] sm:$0xff] }
  0x3f   : > { %877 = vmatpush3.bf16.msra.mxu1 %v957_v21 }
  0x40   : > { %878 = vmatprep.subr.bf16.mxu1 %v958_v22 }
  0x43   : > { %869 = vmatmul.mubr.msk.bf16.gmra.mrb[4].mxu0 %vm398_vm1, %v374_v20  ;;  %879 = vmatpush3.bf16.msra.mxu1 %v958_v22  ;;  %v509_v22 = vld [vmem:[#allocation2 + $0x8] sm:$0xff] }
  0x44   : > { %880 = vmatprep.subr.bf16.mxu1 %v959_v23 }
  0x47   : > { %881 = vmatpush3.bf16.msra.mxu1 %v959_v23 }
  0x48   : > { %882 = vmatprep.subr.bf16.mxu1 %v960_v24 }
  0x4b   : > { %883 = vmatpush3.bf16.msra.mxu1 %v960_v24 }
  0x4c   : > { %884 = vmatprep.subr.bf16.mxu1 %v961_v25 }
  0x4f   : > { %885 = vmatpush3.bf16.msra.mxu1 %v961_v25 }
  0x50   : > { %886 = vmatprep.subr.bf16.mxu1 %v962_v26 }
  0x53   : > { %887 = vmatpush3.bf16.msra.mxu1 %v962_v26 }
 0x10e   : > { %v866_v28 = vpop.f32.mrb[0].mxu0 }
 0x10f   : > { %v454_v29 = vadd.f32 %v866_v28, %v823_v27  ;;  %v445_v30 = vpop.f32.mrb[1].mxu0  ;;  %v514_v28 = vld [vmem:[#allocation2 + $0x30] sm:$0xff] }
 0x110   : > { %v446_v31 = vadd.f32 %v823_v27, %v445_v30  ;;  %v867_v32 = vpop.f32.mrb[2].mxu0 }
 0x111   : > { %v478_v33 = vmul.f32 0.5, %v454_v29  ;;  %v457_v34 = vadd.f32 %v867_v32, %v823_v27  ;;  %v448_v35 = vpop.f32.mrb[3].mxu0  ;;  %v512_v29 = vld [vmem:[#allocation2 + $0x20] sm:$0xff] }
 0x112   : > { %v476_v36 = vmul.f32 0.5, %v446_v31  ;;  %v449_v37 = vadd.f32 %v823_v27, %v448_v35  ;;  %v515_v31 = vld [vmem:[#allocation2 + $0x38] sm:$0xff] }
 0x113   : > { %963 = vtanh.f32 %v478_v33  ;;  %v479_v38 = vmul.f32 0.5, %v457_v34  ;;  %v513_v34 = vld [vmem:[#allocation2 + $0x28] sm:$0xff] }
 0x114   : > { %965 = vtanh.f32 %v476_v36  ;;  %v477_v39 = vmul.f32 0.5, %v449_v37 }
 0x115   : > { %967 = vtanh.f32 %v479_v38 }
 0x116   : > { %969 = vtanh.f32 %v477_v39  ;;  %v870_v40 = vpop.f32.mrb[4].mxu0 }
 0x117   : > { %v470_v41 = vadd.f32 %v870_v40, %v823_v27  ;;  %v461_v42 = vpop.f32.mrb[5].mxu0 }
 0x118   : > { %v462_v43 = vadd.f32 %v823_v27, %v461_v42  ;;  %v871_v44 = vpop.f32.mrb[6].mxu0 }
 0x119   : > { %v482_v45 = vmul.f32 0.5, %v470_v41  ;;  %v473_v46 = vadd.f32 %v871_v44, %v823_v27  ;;  %v464_v47 = vpop.f32.mrb[7].mxu0  ;;  %v839_v41 = vld [vmem:[%s1233_s4] ss:$0 sm:$0xff] (!%p838_p0) }
 0x11a   : > { %v480_v48 = vmul.f32 0.5, %v462_v43  ;;  %v465_v49 = vadd.f32 %v823_v27, %v464_v47 }
 0x11b   : > { %971 = vtanh.f32 %v482_v45  ;;  %v483_v50 = vmul.f32 0.5, %v473_v46 }
 0x11c   : > { %973 = vtanh.f32 %v480_v48  ;;  %v481_v51 = vmul.f32 0.5, %v465_v49 }
 0x11d   : > { %v964_v52 = vpop.eup %963  ;;  %975 = vtanh.f32 %v483_v50 }
 0x11e   : > { %v966_v53 = vpop.eup %965  ;;  %v494_v54 = vmul.f32 0.5, %v964_v52  ;;  %977 = vtanh.f32 %v481_v51 }
 0x11f   : > { %v968_v55 = vpop.eup %967  ;;  %v492_v56 = vmul.f32 0.5, %v966_v53 }
 0x120   : > { %v970_v57 = vpop.eup %969  ;;  %v495_v58 = vmul.f32 0.5, %v968_v55  ;;  %v502_v60 = vadd.f32 0.5, %v494_v54 }
 0x121   : > { %v493_v59 = vmul.f32 0.5, %v970_v57  ;;  %v500_v62 = vadd.f32 0.5, %v492_v56 }
 0x122   : > { %v503_v61 = vadd.f32 0.5, %v495_v58 }
 0x123   : > { %v501_v63 = vadd.f32 0.5, %v493_v59 }
 0x124   : > { %v517_v0 = vpack.c.bf16 %v503_v61, %v502_v60 }
 0x125   : > { %v972_v1 = vpop.eup %971  ;;  %v516_v2 = vpack.c.bf16 %v501_v63, %v500_v62 }
 0x126   : > { %v974_v3 = vpop.eup %973  ;;  %v498_v4 = vmul.f32 0.5, %v972_v1 }
 0x127   : > { %v976_v5 = vpop.eup %975  ;;  %v496_v6 = vmul.f32 0.5, %v974_v3  ;;  %888 = vmatprep.mubr.bf16.mxu1 %v516_v2 }
 0x128   : > { %v978_v7 = vpop.eup %977  ;;  %v499_v8 = vmul.f32 0.5, %v976_v5  ;;  %889 = vmatmul.mubr.bf16.vlgmr.msra.gmra.mrb[0].mxu1 %v517_v0  ;;  %v506_v10 = vadd.f32 0.5, %v498_v4 }
 0x129   : > { %v497_v9 = vmul.f32 0.5, %v978_v7  ;;  %v504_v12 = vadd.f32 0.5, %v496_v6 }
 0x12a   : > { %v507_v11 = vadd.f32 0.5, %v499_v8 }
 0x12b   : > { %v505_v13 = vadd.f32 0.5, %v497_v9 }
 0x12c   : > { %v519_v14 = vpack.c.bf16 %v507_v11, %v506_v10 }
 0x12d   : > { %v518_v15 = vpack.c.bf16 %v505_v13, %v504_v12 }
 0x12f   : > { %892 = vmatprep.mubr.bf16.mxu1 %v518_v15 }
 0x130   : > { %893 = vmatmul.mubr.bf16.gmra.mrb[4].mxu1 %v519_v14 }
 0x1fb   : > { %v890_v18 = vpop.f32.mrb[0].mxu1 }
 0x1fc   : > { %v651_v20 = vadd.f32 %v890_v18, %v510_v16  ;;  %v618_v21 = vpop.f32.mrb[1].mxu1 }
 0x1fd   : > { %v649_v23 = vadd.f32 %v618_v21, %v508_v17  ;;  %v891_v24 = vpop.f32.mrb[2].mxu1 }
 0x1fe   : > { %660 = vst.msk [vmem:[#allocation2 + $0x10] sm:$0xff] %vm657_vm2, %v651_v20  ;;  %v652_v25 = vadd.f32 %v891_v24, %v511_v19  ;;  %v621_v26 = vpop.f32.mrb[3].mxu1 }
 0x1ff   : > { %658 = vst.msk [vmem:[#allocation2] sm:$0xff] %vm657_vm2, %v649_v23  ;;  %v650_v27 = vadd.f32 %v621_v26, %v509_v22 }
 0x200   : > { %661 = vst.msk [vmem:[#allocation2 + $0x18] sm:$0xff] %vm657_vm2, %v652_v25 }
 0x201   : > { %659 = vst.msk [vmem:[#allocation2 + $0x8] sm:$0xff] %vm657_vm2, %v650_v27 }
 0x203   : > { %v894_v30 = vpop.f32.mrb[4].mxu1  ;;  %669 = sbr.rel (%p838_p0) target bundleno = 532 (0x214), region = 89 }
 0x204   : > { %v655_v32 = vadd.f32 %v894_v30, %v514_v28  ;;  %v634_v33 = vpop.f32.mrb[5].mxu1 }
 0x205   : > { %v653_v35 = vadd.f32 %v634_v33, %v512_v29  ;;  %v895_v36 = vpop.f32.mrb[6].mxu1  ;;  %v672_v45 = vld [vmem:[#allocation2 + $0x10] sm:$0xff] (!%p838_p0) }
 0x206   : > { %664 = vst.msk [vmem:[#allocation2 + $0x30] sm:$0xff] %vm657_vm2, %v655_v32  ;;  %v656_v37 = vadd.f32 %v895_v36, %v515_v31  ;;  %v637_v38 = vpop.f32.mrb[7].mxu1  ;;  %v670_v40 = vld [vmem:[#allocation2] sm:$0xff] (!%p838_p0)  ;;  %v687_v48 = vadd.f32 (!%p838_p0), %v839_v41, %v672_v45 }
 0x207   : > { %662 = vst.msk [vmem:[#allocation2 + $0x20] sm:$0xff] %vm657_vm2, %v653_v35  ;;  %v654_v39 = vadd.f32 %v637_v38, %v513_v34  ;;  %v685_v43 = vadd.f32 (!%p838_p0), %v839_v41, %v670_v40  ;;  %v673_v46 = vld [vmem:[#allocation2 + $0x18] sm:$0xff] (!%p838_p0) }
 0x208   : > { %665 = vst.msk [vmem:[#allocation2 + $0x38] sm:$0xff] %vm657_vm2, %v656_v37  ;;  %v671_v42 = vld [vmem:[#allocation2 + $0x8] sm:$0xff] (!%p838_p0)  ;;  %v688_v49 = vadd.f32 (!%p838_p0), %v839_v41, %v673_v46  ;;  %695 = vst.msk [vmem:[%s1146_s9 + $0x10] sm:$0xff] (!%p838_p0), %vm657_vm2, %v687_v48 }
 0x209   : > { %663 = vst.msk [vmem:[#allocation2 + $0x28] sm:$0xff] %vm657_vm2, %v654_v39  ;;  %v686_v44 = vadd.f32 (!%p838_p0), %v839_v41, %v671_v42  ;;  %693 = vst.msk [vmem:[%s1146_s9] sm:$0xff] (!%p838_p0), %vm657_vm2, %v685_v43 }
 0x20a   : > { %696 = vst.msk [vmem:[%s1146_s9 + $0x18] sm:$0xff] %vm657_vm2, %v688_v49 }
 0x20b   : > { %694 = vst.msk [vmem:[%s1146_s9 + $0x8] sm:$0xff] %vm657_vm2, %v686_v44 }
 0x20d   : > { %v676_v52 = vld [vmem:[#allocation2 + $0x30] sm:$0xff] }
 0x20e   : > { %v674_v47 = vld [vmem:[#allocation2 + $0x20] sm:$0xff]  ;;  %v691_v55 = vadd.f32 %v839_v41, %v676_v52 }
 0x20f   : > { %v689_v50 = vadd.f32 %v839_v41, %v674_v47  ;;  %v677_v53 = vld [vmem:[#allocation2 + $0x38] sm:$0xff] }
 0x210   : > { %v675_v51 = vld [vmem:[#allocation2 + $0x28] sm:$0xff]  ;;  %v692_v56 = vadd.f32 %v839_v41, %v677_v53  ;;  %699 = vst.msk [vmem:[%s1146_s9 + $0x30] sm:$0xff] %vm657_vm2, %v691_v55 }
 0x211   : > { %v690_v54 = vadd.f32 %v839_v41, %v675_v51  ;;  %697 = vst.msk [vmem:[%s1146_s9 + $0x20] sm:$0xff] %vm657_vm2, %v689_v50 }
 0x212   : > { %700 = vst.msk [vmem:[%s1146_s9 + $0x38] sm:$0xff] %vm657_vm2, %v692_v56 }
 0x213   : > { %698 = vst.msk [vmem:[%s1146_s9 + $0x28] sm:$0xff] %vm657_vm2, %v690_v54 }
 0x214 PF: > { %s15_s24 = sadd.s32 1, %s1033_s24   ;;  %s1235_s18 = smov %s1013_s19 }
 0x215   : > { %p12_p1 = scmp.ge.s32.totalorder %s15_s24, 10   ;;  %s1236_s19 = smov %s1115_s29 }
 0x216   : > { %s1237_s20 = smov %s1025_s22  ;;  %s1238_s21 = smov %s1029_s23 }
 0x217   : > { %s1239_s22 = smov %s1242_s25  ;;  %s1240_s23 = smov %s1246_s26 }
 0x218   :  { %14 = sbr.rel (!%p12_p1) target bundleno = 4 (0x4), region = 133 }

</bundles_post_ra>
